<compile_context>
chip_gen: v6e
topology: v6e:2x2x1
jax: 0.10.0
libtpu: 0.0.40
codegen_flags: <defaults>
</compile_context>

<pallas_src>
import jax
import jax.numpy as jnp
from jax.experimental import pallas as pl
from jax.experimental.pallas import tpu as pltpu


def _block_kernel(x_ref, w_ref, b_ref, o_ref, act_ref):
    """One (batch-tile, layer) grid step.

    x_ref:   (bm, F)      input activations (resident across the layer axis)
    w_ref:   (1, F, F)    f32 weights for layer l (per-layer tile)
    b_ref:   (L, F)       f32 biases, full array resident (tiny)
    o_ref:   (bm, F)      output tile (written on the last layer step)
    act_ref: (bm, F) f32  VMEM scratch carrying the activation across layers
    """
    l = pl.program_id(1)
    num_layers = pl.num_programs(1)

    @pl.when(l == 0)
    def _():
        act_ref[...] = x_ref[...].astype(jnp.float32)

    # bf16 operands on the MXU, f32 accumulation.  The bf16 cast of the weight
    # tile is VPU work hidden under the matmul / next-layer weight DMA.
    w = w_ref[0].astype(jnp.bfloat16)                       # (F, F)
    a = act_ref[...].astype(jnp.bfloat16)                   # (bm, F)
    y = jnp.dot(a, w, preferred_element_type=jnp.float32)   # (bm, F) f32
    act_ref[...] = y + b_ref[pl.ds(l, 1), :]                # + (1, F) broadcast

    @pl.when(l == num_layers - 1)
    def _():
        o_ref[...] = act_ref[...].astype(o_ref.dtype)


def block_forward(x, weights, biases, *, out_dtype=None):
    """Sequentially applies L linear layers inside a single Pallas kernel.

    x:        (B, F)
    weights:  (L, F, F)  -- weights[l] is (in_features, out_features)
    biases:   (L, F)
    """
    B, F = x.shape
    L = weights.shape[0]
    assert weights.shape == (L, F, F)
    assert biases.shape == (L, F)
    out_dtype = out_dtype if out_dtype is not None else x.dtype

    # Batch tile: whole batch for small B; 128-row tiles when B is large and
    # divisible (keeps the (8,128) layout rules trivially satisfied).
    if B <= 128 or B % 128 != 0:
        bm = B
    else:
        bm = 128
    grid = (pl.cdiv(B, bm), L)

    # Explicit VMEM budget: 2 double-buffered f32 weight tiles + double-buffered
    # x/out tiles + f32 activation scratch + resident biases, with 2x headroom.
    est_bytes = (
        2 * F * F * 4            # double-buffered f32 weight tiles
        + 2 * 2 * bm * F * 4     # x and out tiles, double-buffered
        + bm * F * 4             # f32 activation scratch
        + L * F * 4              # resident biases
    )
    vmem_limit = int(min(100 << 20, max(2 * est_bytes, 4 << 20)))

    return pl.pallas_call(
        _block_kernel,
        out_shape=jax.ShapeDtypeStruct((B, F), out_dtype),
        grid_spec=pltpu.PrefetchScalarGridSpec(
            num_scalar_prefetch=0,
            grid=grid,
            in_specs=[
                # x: one batch tile, resident across the layer axis.
                pl.BlockSpec((bm, F), lambda b, l: (b, 0)),
                # weights: one (F, F) layer tile per grid step (pipelined).
                pl.BlockSpec((1, F, F), lambda b, l: (l, 0, 0)),
                # biases: tiny, keep the whole (L, F) array resident.
                pl.BlockSpec((L, F), lambda b, l: (0, 0)),
            ],
            out_specs=pl.BlockSpec((bm, F), lambda b, l: (b, 0)),
            scratch_shapes=[pltpu.VMEM((bm, F), jnp.float32)],
        ),
        compiler_params=pltpu.CompilerParams(
            dimension_semantics=("parallel", "arbitrary"),
            vmem_limit_bytes=vmem_limit,
        ),
    )(x, weights, biases)


def _reference_bf16(x, weights, biases):
    """Reference matching the kernel's math (bf16 operands, f32 accumulation)."""
    y = x.astype(jnp.float32)
    for l in range(weights.shape[0]):
        y = jnp.dot(
            y.astype(jnp.bfloat16),
            weights[l].astype(jnp.bfloat16),
            preferred_element_type=jnp.float32,
        ) + biases[l].astype(jnp.float32)
    return y.astype(x.dtype)


def _reference_f32(x, weights, biases):
    """Pure f32 reference (loose tolerance vs. the bf16-operand kernel)."""
    y = x.astype(jnp.float32)
    for l in range(weights.shape[0]):
        y = y @ weights[l].astype(jnp.float32) + biases[l].astype(jnp.float32)
    return y.astype(x.dtype)


if __name__ == "__main__":
    # Small shapes consistent with the module: Block(features=128, num_layers=4),
    # batch of 8 input rows.
    B, F, L = 8, 128, 4

    key = jax.random.PRNGKey(0)
    kx, kw, kb = jax.random.split(key, 3)

    # Deterministic synthetic parameters (PyTorch-like uniform(-1/sqrt(F), 1/sqrt(F))).
    bound = 1.0 / jnp.sqrt(jnp.float32(F))
    x = jax.random.normal(kx, (B, F), dtype=jnp.float32)
    weights = jax.random.uniform(kw, (L, F, F), dtype=jnp.float32,
                                 minval=-bound, maxval=bound)
    biases = jax.random.uniform(kb, (L, F), dtype=jnp.float32,
                                minval=-bound, maxval=bound)

    out = jax.block_until_ready(block_forward(x, weights, biases))
    assert out.shape == (B, F)

    # Exact-math reference (bf16 operands, f32 accumulation): tight tolerance.
    ref_bf16 = _reference_bf16(x, weights, biases)
    assert jnp.allclose(out, ref_bf16, atol=1e-3, rtol=1e-3), \
        "mismatch vs. bf16-operand JAX reference"

    # Pure-f32 reference: loose tolerance (bf16 operand rounding is expected).
    ref_f32 = _reference_f32(x, weights, biases)
    assert jnp.allclose(out, ref_f32, atol=5e-2, rtol=5e-2), \
        "mismatch vs. f32 JAX reference"

    print("KERNEL_OK")
</pallas_src>

<mosaic_0001>
module attributes {stable_mosaic.version = 11 : i64} {
  func.func @_block_kernel(%arg0: i32, %arg1: i32, %arg2: memref<8x128xf32, #tpu.memory_space<vmem>>, %arg3: memref<1x128x128xf32, #tpu.memory_space<vmem>>, %arg4: memref<4x128xf32, #tpu.memory_space<vmem>>, %arg5: memref<8x128xf32, #tpu.memory_space<vmem>>, %arg6: memref<8x128xf32, #tpu.memory_space<vmem>>) attributes {dimension_semantics = [#tpu.dimension_semantics<parallel>, #tpu.dimension_semantics<arbitrary>], iteration_bounds = array<i64: 1, 4>, scalar_prefetch = 0 : i64, scratch_operands = 1 : i64, tpu.core_type = #tpu.core_type<tc>, window_params = [{transform_indices = @transform_0, window_bounds = array<i64: 8, 128>}, {transform_indices = @transform_1, window_bounds = array<i64: 1, 128, 128>}, {pipeline_mode = #tpu.pipeline_mode<synchronous>, transform_indices = @transform_2, window_bounds = array<i64: 4, 128>}, {transform_indices = @transform_3, window_bounds = array<i64: 8, 128>}]} {
    %c0_i32 = arith.constant 0 : i32
    %0 = arith.cmpi eq, %arg1, %c0_i32 : i32
    %1 = arith.extui %0 : i1 to i32
    %c0_i32_0 = arith.constant 0 : i32
    %2 = arith.cmpi ne, %1, %c0_i32_0 : i32
    scf.if %2 {
      %c0_9 = arith.constant 0 : index
      %c0_10 = arith.constant 0 : index
      %17 = vector.load %arg2[%c0_9, %c0_10] : memref<8x128xf32, #tpu.memory_space<vmem>>, vector<8x128xf32>
      %c0_11 = arith.constant 0 : index
      %c0_12 = arith.constant 0 : index
      %18 = vector.load %arg6[%c0_11, %c0_12] : memref<8x128xf32, #tpu.memory_space<vmem>>, vector<8x128xf32>
      tpu.vector_store %arg6[%c0_11, %c0_12], %17 {strides = array<i32>} : memref<8x128xf32, #tpu.memory_space<vmem>>, vector<8x128xf32>,
    } else {
    }
    %c0 = arith.constant 0 : index
    %c0_1 = arith.constant 0 : index
    %c0_2 = arith.constant 0 : index
    %3 = vector.load %arg3[%c0, %c0_1, %c0_2] : memref<1x128x128xf32, #tpu.memory_space<vmem>>, vector<1x128x128xf32>
    %4 = vector.shape_cast %3 : vector<1x128x128xf32> to vector<128x128xf32>
    %5 = arith.truncf %4 : vector<128x128xf32> to vector<128x128xbf16>
    %c0_3 = arith.constant 0 : index
    %c0_4 = arith.constant 0 : index
    %6 = vector.load %arg6[%c0_3, %c0_4] : memref<8x128xf32, #tpu.memory_space<vmem>>, vector<8x128xf32>
    %7 = arith.truncf %6 : vector<8x128xf32> to vector<8x128xbf16>
    %cst = arith.constant dense<0.000000e+00> : vector<8x128xf32>
    %8 = tpu.matmul %7, %5, %cst {dimension_numbers = #tpu.dot_dimension_numbers<[1], [0], [0], [1], [0, 0, 1, 1], [], []>} : vector<8x128xbf16>, vector<128x128xbf16>, vector<8x128xf32> -> vector<8x128xf32>
    %9 = arith.index_cast %arg1 : i32 to index
    %c0_5 = arith.constant 0 : index
    %10 = vector.load %arg4[%9, %c0_5] : memref<4x128xf32, #tpu.memory_space<vmem>>, vector<1x128xf32>
    %11 = vector.broadcast %10 : vector<1x128xf32> to vector<8x128xf32>
    %12 = arith.addf %8, %11 : vector<8x128xf32>
    %c0_6 = arith.constant 0 : index
    %c0_7 = arith.constant 0 : index
    %13 = vector.load %arg6[%c0_6, %c0_7] : memref<8x128xf32, #tpu.memory_space<vmem>>, vector<8x128xf32>
    tpu.vector_store %arg6[%c0_6, %c0_7], %12 {strides = array<i32>} : memref<8x128xf32, #tpu.memory_space<vmem>>, vector<8x128xf32>,
    %c3_i32 = arith.constant 3 : i32
    %14 = arith.cmpi eq, %arg1, %c3_i32 : i32
    %15 = arith.extui %14 : i1 to i32
    %c0_i32_8 = arith.constant 0 : i32
    %16 = arith.cmpi ne, %15, %c0_i32_8 : i32
    scf.if %16 {
      %c0_9 = arith.constant 0 : index
      %c0_10 = arith.constant 0 : index
      %17 = vector.load %arg6[%c0_9, %c0_10] : memref<8x128xf32, #tpu.memory_space<vmem>>, vector<8x128xf32>
      %c0_11 = arith.constant 0 : index
      %c0_12 = arith.constant 0 : index
      %18 = vector.load %arg5[%c0_11, %c0_12] : memref<8x128xf32, #tpu.memory_space<vmem>>, vector<8x128xf32>
      tpu.vector_store %arg5[%c0_11, %c0_12], %17 {strides = array<i32>} : memref<8x128xf32, #tpu.memory_space<vmem>>, vector<8x128xf32>,
    } else {
    }
    return
  }
  func.func @transform_0(%arg0: i32, %arg1: i32) -> (i32, i32) {
    %c0_i32 = arith.constant 0 : i32
    %c0_i32_0 = arith.constant 0 : i32
    return %arg0, %c0_i32 : i32, i32
  }
  func.func @transform_1(%arg0: i32, %arg1: i32) -> (i32, i32, i32) {
    %c0_i32 = arith.constant 0 : i32
    %c0_i32_0 = arith.constant 0 : i32
    %c0_i32_1 = arith.constant 0 : i32
    return %arg1, %c0_i32, %c0_i32_0 : i32, i32, i32
  }
  func.func @transform_2(%arg0: i32, %arg1: i32) -> (i32, i32) {
    %c0_i32 = arith.constant 0 : i32
    %c0_i32_0 = arith.constant 0 : i32
    %c0_i32_1 = arith.constant 0 : i32
    return %c0_i32, %c0_i32_0 : i32, i32
  }
  func.func @transform_3(%arg0: i32, %arg1: i32) -> (i32, i32) {
    %c0_i32 = arith.constant 0 : i32
    %c0_i32_0 = arith.constant 0 : i32
    return %arg0, %c0_i32 : i32, i32
  }
}

</mosaic_0001>

<bundles_post_ra>
// kernel: tpu_custom_call.1
= control target key start
LH: loop header
LB: loop body
LE: loop exit
PB: predicated region body
PF: predicated region fallthrough
CT: control target
= control target key end

     0   :  { %8 = vsyncpa [#allocation4], 0  ;;  %s905_s0 = inlined_call_operand.hbm [shape: f32[8,128], index: 0, kind: input, shape index: {}]   ;;  %s906_s1 = inlined_call_operand.hbm [shape: f32[4,128,128], index: 1, kind: input, shape index: {}]   ;;  %s907_s2 = inlined_call_operand.hbm [shape: f32[4,128], index: 2, kind: input, shape index: {}]   ;;  %s908_s3 = inlined_call_operand.hbm [shape: f32[8,128], index: 3, kind: output, shape index: {}]  }
   0x1   :  { %9 = vsyncpa [#allocation7], 0 }
   0x2   :  { %11 = vsyncpa [#allocation7 + $0x1], 0 }
   0x3   :  { %12 = vsyncpa [#allocation5], 0  ;;  %s738_s12 = smov 0   ;;  %s740_s13 = smov 0  }
   0x4   :  { %s742_s14 = smov 0   ;;  %s744_s15 = smov 0  }
   0x5   :  { %s746_s16 = smov 0   ;;  %s748_s17 = smov 0  }
   0x6 LB: > { %s767_s18 = sadd.s32 4294967295, %s708_s17   ;;  %s63_s19 = sadd.s32 1, %s696_s14  ;;  %s708_s17 = sphi %s748_s17, %s18_s17   ;;  %s704_s16 = sphi %s746_s16, %s926_s16   ;;  %s700_s15 = sphi %s744_s15, %s925_s15   ;;  %s696_s14 = sphi %s742_s14, %s924_s14   ;;  %s692_s13 = sphi %s740_s13, %s923_s13   ;;  %s688_s12 = sphi %s738_s12, %s922_s12  }
   0x7   : > { %p70_p0 = scmp.ne.s32.totalorder %s696_s14, %s692_s13  ;;  %p71_p1 = scmp.eq.s32.totalorder %s708_s17, 0 }
   0x8   : > { %p76_p2 = scmp.ne.s32.totalorder %s692_s13, %s688_s12  ;;  %p909_p3 = scmp.eq.s32.totalorder %s767_s18, 0 }
   0x9   : > { %p72_p4 = por %p71_p1, %p70_p0  ;;  %p407_p5 = scmp.ge.s32.totalorder %s708_s17, 1 }
   0xa   : > { %p778_p6 = por %p909_p3, %p76_p2  ;;  %p134_p7 = scmp.lt.s32.totalorder %s708_s17, 5 }
   0xb   : > { %s710_s22 = smov [#allocation8]   ;;  %p482_p10 = scmp.lt.s32.totalorder %s708_s17, 4 }
   0xc   : > { %s912_s20 = scalar_select %p778_p6, 1, 0 }
   0xd   : > { %p783_p8 = pnand %p407_p5, %p134_p7  ;;  %s160_s23 = sshll.u32 %s710_s22, 4  ;;  %s161_s23 = int_to_ptr.vmem [resolvable:$true] %s160_s23 }
   0xe   : > { %p796_p12 = pnand %p482_p10, %p72_p4  ;;  %s711_s26 = smov [#allocation3]  }
   0xf   : > { %s913_s21 = scalar_select %p783_p8, 1, 0 }
  0x10   : > { %p469_p9 = pneg %p783_p8  ;;  %s149_s27 = sshll.u32 %s711_s26, 4  ;;  %s150_s27 = int_to_ptr.vmem [resolvable:$true] %s149_s27 }
  0x11   : > { %s553_s28 = scalar_lea.vmem %s161_s23, 64  ;;  %p561_p5 = scmp.lt.s32.totalorder %s161_s23, %s161_s23 }
  0x12   : > { %p792_p11 = pnand %p469_p9, %p909_p3  ;;  %p554_p0 = scmp.ne.s32.totalorder %s161_s23, %s553_s28 }
  0x13   : > { %p562_p7 = scmp.lt.s32.totalorder %s553_s28, %s553_s28 }
  0x14   : > { %p544_p13 = pneg %p792_p11 }
  0x15   : > { %p563_p9 = por %p562_p7, %p561_p5 }
  0x16   : > { %p556_p1 = pnand %p554_p0, %p544_p13 }
  0x18   : > { %p557_p2 = pneg %p556_p1 }
  0x1a   : > { %p564_p3 = pnand %p563_p9, %p557_p2 }
  0x1c   : > { %567 = shalt.err (!%p564_p3)
}
  0x1d   : > { %475 = dma.hbm_to_vmem [thread:$0]  (!%p792_p11), %s907_s2, 64, %s161_s23, [#allocation7]  }
  0x1e   : > { %s579_s4 = scalar_lea.vmem %s150_s27, 128  ;;  %p587_p1 = scmp.lt.s32.totalorder %s150_s27, %s150_s27 }
  0x1f   : > { %p580_p4 = scmp.ne.s32.totalorder %s150_s27, %s579_s4  ;;  %p588_p6 = scmp.lt.s32.totalorder %s579_s4, %s579_s4 }
  0x21   : > { %p582_p10 = pnand %p580_p4, %p544_p13  ;;  %p589_p8 = por %p588_p6, %p587_p1 }
  0x23   : > { %p583_p0 = pneg %p582_p10 }
  0x25   : > { %p590_p5 = pnand %p589_p8, %p583_p0 }
  0x27   : > { %593 = shalt.err (!%p590_p5)
}
  0x28   : > { %472 = dma.hbm_to_vmem [thread:$0]  (!%p792_p11), %s905_s0, 128, %s150_s27, [#allocation4]  }
  0x29   : > { %s171_s7 = sand.u32 1, %s708_s17   ;;  %s27_s8 = sadd.s32 1, %s704_s16 }
  0x2a   : > { %p28_p3 = scmp.ge.s32.totalorder %s27_s8, 4  ;;  %s173_s9 = sand.u32 1, %s696_s14  }
  0x2b   : > { %s411_s10 = sshll.u32 %s173_s9, 7  ;;  %s425_s11 = sshll.u32 %s704_s16, 11 }
  0x2c   : > { %s928_s8 = smov (%p28_p3, %s27_s8), 0  ;;  %s181_s23 = scalar_lea.hbm %s906_s1, %s425_s11 }
  0x2d   : > { %s60_s24 = ssub.s32 %s704_s16, %s928_s8  ;;  %s175_s26 = scalar_lea.vmem [#allocation6], %s411_s10 }
  0x2e   : > { %s182_s28 = sshll.u32 %s175_s26, 4  ;;  %p61_p6 = scmp.eq.s32.totalorder %s60_s24, 0  ;;  %s183_s28 = int_to_ptr.vmem [resolvable:$true] %s182_s28 }
  0x2f   : > { %s172_s29 = scalar_lea.sflag [#allocation7], %s171_s7  ;;  %p596_p8 = pneg %p796_p12 }
  0x30   : > { %s832_s27 = scalar_select %p61_p6, %s696_s14, %s63_s19  }
  0x31   : > { %s607_s30 = scalar_lea.vmem %s183_s28, 2048  ;;  %s712_s4 = smov [#allocation6]  }
  0x32   : > { %p608_p11 = scmp.ne.s32.totalorder %s183_s28, %s607_s30  ;;  %s612_s5 = sshll.u32 %s712_s4, 4  ;;  %s613_s5 = int_to_ptr.vmem [resolvable:$false] %s612_s5 }
  0x33   : > { %s614_s6 = scalar_lea.vmem %s613_s5, 4096  ;;  %p615_p7 = scmp.lt.s32.totalorder %s183_s28, %s613_s5 }
  0x34   : > { %p610_p13 = pnand %p608_p11, %p596_p8  ;;  %p616_p9 = scmp.lt.s32.totalorder %s614_s6, %s607_s30 }
  0x36   : > { %p611_p2 = pneg %p610_p13  ;;  %p617_p4 = por %p616_p9, %p615_p7 }
  0x38   : > { %p618_p10 = pnand %p617_p4, %p611_p2 }
  0x3a   : > { %621 = shalt.err (!%p618_p10)
}
  0x3b   : > { %s713_s9 = smov 128   ;;  %s714_s19 = smov 8  }
  0x3c   : > { %479 = dma.hbm_to_vmem [thread:$0]  (!%p796_p12), %s181_s23, 2048, %s183_s28, %s172_s29, %s713_s9, %s713_s9, %s714_s19  }
  0x3d   : > { %p916_p0 = scmp.ne.s32.totalorder %s913_s21, 0 }
  0x3e   : > { %p917_p1 = scmp.eq.s32.totalorder (!%p916_p0), %s767_s18, 0 }
  0x3f   : > { %194 = sbr.rel (%p916_p0) target bundleno = 339 (0x153), region = 32 }
  0x44   : > { %671 = dma.done.wait (%p917_p1), [#allocation4], 128   ;;  %p918_p5 = pmov %p917_p1 }
  0x45   : > { %s200_s7 = sand.u32 1, %s767_s18   ;;  %s202_s10 = sand.u32 1, %s692_s13  }
  0x46   : > { %673 = vsyncadd (%p918_p5), [#allocation4], 4294967168  ;;  %s416_s11 = sshll.u32 %s202_s10, 7  ;;  %s201_s12 = scalar_lea.sflag [#allocation7], %s200_s7 }
  0x47   : > { %s846_s22 = scalar_lea.vmem [#allocation6], %s416_s11  ;;  %p919_p3 = scmp.ne.s32.totalorder %s912_s20, 0 }
  0x49   : > { %675 = dma.done.wait (%p919_p3), %s201_s12, 2048  }
  0x4a   : > { %677 = vsyncadd (%p919_p3), %s201_s12, 4294965248  ;;  %p920_p12 = pmov %p917_p1 }
  0x4b   : > { %p921_p6 = pmov %p917_p1 }
  0x4c   : > { %679 = dma.done.wait (%p920_p12), [#allocation7], 64  }
  0x4d   : > { %681 = vsyncadd (%p921_p6), [#allocation7], 4294967232  ;;  %p418_p8 = scmp.ne.s32.totalorder %s700_s15, 0 }
  0x4f   : > { %230 = sbr.rel (%p418_p8) target bundleno = 86 (0x56), region = 48 }
  0x54   : > { %v231_v0 = vld [vmem:[#allocation3] sm:$0xff] }
  0x55   : > { %232 = vst [vmem:[#allocation2] sm:$0xff] %v231_v0 }
  0x56 PF: > { %v247_v1 = vld [vmem:[%s846_s22 + $0x70] sm:$0xff]  ;;  %v248_v2 = vld [vmem:[%s846_s22 + $0x78] sm:$0xff]  ;;  %v245_v3 = vld [vmem:[%s846_s22 + $0x60] sm:$0xff]  ;;  %v715_v4 = vmov 0.0   ;;  %vm716_vm0 = vmmov 0   ;;  %s259_s20 = scalar_lea.vmem [#allocation8], %s700_s15 }
  0x57   : > { %435 = vmatprep.subr.bf16.mxu0 %v715_v4  ;;  %v256_v5 = vpack.c.bf16 %v248_v2, %v247_v1  ;;  %v246_v6 = vld [vmem:[%s846_s22 + $0x68] sm:$0xff]  ;;  %451 = vmatprep.mubr.msk.bf16.mxu0 %vm716_vm0, %v715_v4  ;;  %v243_v8 = vld [vmem:[%s846_s22 + $0x50] sm:$0xff]  ;;  %v244_v9 = vld [vmem:[%s846_s22 + $0x58] sm:$0xff]  ;;  %p420_p11 = scmp.ne.s32.totalorder %s700_s15, 3 }
  0x58   : > { %v255_v7 = vpack.c.bf16 %v246_v6, %v245_v3  ;;  %v254_v10 = vpack.c.bf16 %v244_v9, %v243_v8  ;;  %v241_v11 = vld [vmem:[%s846_s22 + $0x40] sm:$0xff]  ;;  %v242_v12 = vld [vmem:[%s846_s22 + $0x48] sm:$0xff]  ;;  %v239_v14 = vld [vmem:[%s846_s22 + $0x30] sm:$0xff] }
  0x59   : > { %436 = vmatpush3.bf16.msra.mxu0 %v256_v5  ;;  %v253_v13 = vpack.c.bf16 %v242_v12, %v241_v11  ;;  %v240_v15 = vld [vmem:[%s846_s22 + $0x38] sm:$0xff]  ;;  %v237_v17 = vld [vmem:[%s846_s22 + $0x20] sm:$0xff]  ;;  %v238_v18 = vld [vmem:[%s846_s22 + $0x28] sm:$0xff] }
  0x5a   : > { %437 = vmatprep.subr.bf16.mxu0 %v715_v4  ;;  %v252_v16 = vpack.c.bf16 %v240_v15, %v239_v14  ;;  %v251_v19 = vpack.c.bf16 %v238_v18, %v237_v17  ;;  %v235_v20 = vld [vmem:[%s846_s22 + $0x10] sm:$0xff]  ;;  %v236_v21 = vld [vmem:[%s846_s22 + $0x18] sm:$0xff]  ;;  %v233_v23 = vld [vmem:[%s846_s22] sm:$0xff] }
  0x5b   : > { %v250_v22 = vpack.c.bf16 %v236_v21, %v235_v20  ;;  %v234_v24 = vld [vmem:[%s846_s22 + $0x8] sm:$0xff]  ;;  %v419_v28 = vld [vmem:[%s259_s20] ss:$0 sm:$0xff] }
  0x5c   : > { %v249_v25 = vpack.c.bf16 %v234_v24, %v233_v23  ;;  %v257_v26 = vld [vmem:[#allocation2] sm:$0xff] }
  0x5d   : > { %438 = vmatpush3.bf16.msra.mxu0 %v255_v7  ;;  %v258_v27 = vpack.c.bf16 %v257_v26, %v257_v26 }
  0x5e   : > { %439 = vmatprep.subr.bf16.mxu0 %v715_v4 }
  0x61   : > { %440 = vmatpush3.bf16.msra.mxu0 %v254_v10 }
  0x62   : > { %441 = vmatprep.subr.bf16.mxu0 %v715_v4 }
  0x65   : > { %442 = vmatpush3.bf16.msra.mxu0 %v253_v13 }
  0x66   : > { %443 = vmatprep.subr.bf16.mxu0 %v715_v4 }
  0x69   : > { %444 = vmatpush3.bf16.msra.mxu0 %v252_v16 }
  0x6a   : > { %445 = vmatprep.subr.bf16.mxu0 %v715_v4 }
  0x6d   : > { %446 = vmatpush3.bf16.msra.mxu0 %v251_v19 }
  0x6e   : > { %447 = vmatprep.subr.bf16.mxu0 %v715_v4 }
  0x71   : > { %448 = vmatpush3.bf16.msra.mxu0 %v250_v22 }
  0x72   : > { %449 = vmatprep.subr.bf16.mxu0 %v715_v4 }
  0x75   : > { %450 = vmatpush3.bf16.msra.mxu0 %v249_v25 }
  0x78   : > { %452 = vmatmul.mubr.bf16.vlgmr.msra.gmra.mxu0 %v258_v27 }
 0x138   : > { %v299_v29 = vpop.f32.mrf.mxu0 }
 0x139   : > { %v300_v30 = vadd.f32 %v419_v28, %v299_v29 }
 0x13a   : > { %v453_v31 = vpop.f32.mrf.mxu0  ;;  %309 = sbr.rel (%p420_p11) target bundleno = 324 (0x144), region = 52 }
 0x13b   : > { %305 = vst [vmem:[#allocation2] sm:$0xff] %v300_v30 }
 0x13c   : > { %v302_v32 = vpop.f32.mrf.mxu0 }
 0x13e   : > { %v454_v33 = vpop.f32.mrf.mxu0 }
 0x142   : > { %v310_v34 = vld [vmem:[#allocation2] sm:$0xff] }
 0x143   : > { %311 = vst [vmem:[#allocation9] sm:$0xff] %v310_v34 }
 0x144 PF: > { %p485_p13 = scmp.eq.s32.totalorder %s767_s18, 3  ;;  %s717_s21 = smov [#allocation9]  }
 0x145   : > { %s321_s25 = sshll.u32 %s717_s21, 4  ;;  %s322_s25 = int_to_ptr.vmem [resolvable:$true] %s321_s25 }
 0x146   : > { %s622_s23 = scalar_lea.vmem %s322_s25, 128  ;;  %p629_p4 = scmp.lt.s32.totalorder %s322_s25, %s322_s25 }
 0x147   : > { %p623_p2 = scmp.ne.s32.totalorder %s322_s25, %s622_s23  ;;  %p630_p10 = scmp.lt.s32.totalorder %s622_s23, %s622_s23 }
 0x149   : > { %p624_p7 = pnand %p623_p2, %p485_p13  ;;  %p631_p0 = por %p630_p10, %p629_p4 }
 0x14b   : > { %p625_p9 = pneg %p624_p7 }
 0x14d   : > { %p632_p1 = pnand %p631_p0, %p625_p9 }
 0x14f   : > { %635 = shalt.err (!%p632_p1)
}
 0x150   : > { %466 = dma.vmem_to_hbm [thread:$0]  (%p485_p13), %s322_s25, 128, %s908_s3, [#allocation5]  }
 0x151   : > { %683 = dma.done.wait (%p485_p13), [#allocation5], 128  }
 0x152   : > { %685 = vsyncadd (%p485_p13), [#allocation5], 4294967168 }
 0x153 PF: > { %s18_s17 = sadd.s32 1, %s708_s17   ;;  %s922_s12 = smov %s692_s13 }
 0x154   : > { %p15_p5 = scmp.ge.s32.totalorder %s18_s17, 6   ;;  %s923_s13 = smov %s696_s14 }
 0x155   : > { %s924_s14 = smov %s832_s27  ;;  %s925_s15 = smov %s704_s16 }
 0x156   : > { %s926_s16 = smov %s928_s8  ;;  %17 = sbr.rel (!%p15_p5) target bundleno = 6 (0x6), region = 89 }
 0x15b   :  { %334 = vsyncpa [#allocation4], 1 }
 0x15c   :  { %336 = vsyncpa [#allocation4 + $0x1], 1 }
 0x15d   :  { %337 = vsyncpa [#allocation7], 1 }
 0x15e   :  { %339 = vsyncpa [#allocation7 + $0x1], 1 }
 0x15f   :  { %340 = vsyncpa [#allocation5], 1 }
 0x160   :  { %342 = vsyncpa [#allocation5 + $0x1], 1 }

</bundles_post_ra>
